<compile_context>
chip_gen: v5e
topology: v5e:2x2
jax: 0.10.0
libtpu: 0.0.40
codegen_flags: <defaults>
</compile_context>

<pallas_src>
import functools

import jax
import jax.numpy as jnp
from jax.experimental import pallas as pl
from jax.experimental.pallas import tpu as pltpu


def _round_up(n, m):
    return ((n + m - 1) // m) * m


# --------------------------------------------------------------------------------------
# Kernel
# --------------------------------------------------------------------------------------
def qnet_kernel(x_ref, w1_ref, b1_ref, w3_ref, b3_ref, w4_ref, b4_ref,
                out_ref, psum_ref,
                *, out_size, batch_size, tile_rows, need_row_mask):
    """One batch tile of the fused dueling-DQN forward.

    x_ref   : (TB, in)        bf16  (streamed per tile)
    w1_ref  : (in, F1)        bf16  (VMEM-resident)
    b1_ref  : (1, F1)         f32
    w3_ref  : (F1, F2)        bf16  = [w3_adv || w3_val || 0-pad]
    b3_ref  : (1, F2)         f32
    w4_ref  : (F2, HW)        bf16  block-diag: adv cols [0,out), val col `out`, 0 pad
    b4_ref  : (1, HW)         f32
    out_ref : (TB, HW)        f32   lane-dense slab; cols [0,out) hold val+adv
    psum_ref: (1, 8, HW)      f32   per-tile partial sum of adv (broadcast-filled)
    """
    f32 = jnp.float32
    bf16 = jnp.bfloat16

    # fc1 + relu  (bf16 MXU inputs, f32 accumulate)
    h = jnp.dot(x_ref[...], w1_ref[...], preferred_element_type=f32) + b1_ref[...]
    h = jnp.maximum(h, 0.0)

    # fused advantage|value streams: one lane-dense matmul + relu
    av = jnp.dot(h.astype(bf16), w3_ref[...], preferred_element_type=f32) + b3_ref[...]
    av = jnp.maximum(av, 0.0)

    # fused block-diagonal heads: adv in cols [0,out), val in col `out`, zeros elsewhere
    head = jnp.dot(av.astype(bf16), w4_ref[...], preferred_element_type=f32) + b4_ref[...]

    val = head[:, out_size:out_size + 1]                     # (TB, 1)

    # lane-dense store: cols [0,out) = val + adv; cols >= out are garbage (sliced off).
    out_ref[...] = (head + val).astype(out_ref.dtype)

    # per-tile partial sum of adv over valid rows. Pad head columns are exactly zero,
    # so sum(adv) = sum(head) - sum(val).
    if need_row_mask:
        row0 = pl.program_id(0) * tile_rows
        rows = row0 + jax.lax.broadcasted_iota(jnp.int32, (tile_rows, 1), 0)
        rmask = rows < batch_size
        head_s = jnp.sum(jnp.where(rmask, head, 0.0))
        val_s = jnp.sum(jnp.where(rmask, val, 0.0))
    else:
        head_s = jnp.sum(head)
        val_s = jnp.sum(val)

    psum = head_s - val_s
    psum_ref[...] = jnp.broadcast_to(psum, psum_ref.shape).astype(psum_ref.dtype)


def _resident_spec(shape):
    # weights/biases: full-extent block, constant block index -> fetched once, VMEM-resident
    return pl.BlockSpec(shape, lambda b: (0,) * len(shape))


# --------------------------------------------------------------------------------------
# Wrapper
# --------------------------------------------------------------------------------------
def qnetwork_forward(x, fused, max_tile_rows=1024):
    """x: (B, input_size) float32; fused: dict from fuse_params()."""
    B, in_size = x.shape
    out_size = fused["out_size"]
    HW = fused["w4"].shape[1]           # padded head width (multiple of 128)

    # Batch tiling (tile rows kept a multiple of 16 for bf16 sublane packing).
    if B <= max_tile_rows:
        TB = _round_up(B, 16)
    else:
        assert max_tile_rows % 16 == 0
        TB = max_tile_rows
    B_pad = _round_up(B, TB)
    num_tiles = B_pad // TB

    # pad batch + cast to bf16 in one fused wrapper op (halves the streamed-x DMA bytes)
    x = jnp.pad(x, ((0, B_pad - B), (0, 0))).astype(jnp.bfloat16)

    kernel = functools.partial(
        qnet_kernel,
        out_size=out_size,
        batch_size=B,
        tile_rows=TB,
        need_row_mask=(B_pad != B),
    )

    weights = (fused["w1"], fused["b1"], fused["w3"], fused["b3"],
               fused["w4"], fused["b4"])

    slab, psums = pl.pallas_call(
        kernel,
        grid=(num_tiles,),
        in_specs=[pl.BlockSpec((TB, in_size), lambda b: (b, 0))]
                 + [_resident_spec(w.shape) for w in weights],
        out_specs=[
            pl.BlockSpec((TB, HW), lambda b: (b, 0)),
            pl.BlockSpec((1, 8, HW), lambda b: (b, 0, 0)),
        ],
        out_shape=[
            jax.ShapeDtypeStruct((B_pad, HW), jnp.float32),
            jax.ShapeDtypeStruct((num_tiles, 8, HW), jnp.float32),
        ],
        compiler_params=pltpu.CompilerParams(dimension_semantics=("parallel",)),
    )(x, *weights)

    # Epilogue: global mean over all B*out advantage values, then subtract.
    adv_mean = jnp.sum(psums[:, 0, 0]) / jnp.float32(B * out_size)
    return slab[:B, :out_size] - adv_mean


# --------------------------------------------------------------------------------------
# Parameter construction
# --------------------------------------------------------------------------------------
def init_params(key, input_size, output_size, fc1_unit, fc2_unit):
    """Deterministic synthetic init (PyTorch-Linear-style uniform fan-in scaling).
    Weights stored transposed vs. PyTorch: W has shape (in, out) so y = x @ W + b."""
    ks = jax.random.split(key, 10)

    def linear(kw, kb, fan_in, fan_out):
        bound = 1.0 / jnp.sqrt(jnp.float32(fan_in))
        w = jax.random.uniform(kw, (fan_in, fan_out), jnp.float32, -bound, bound)
        b = jax.random.uniform(kb, (1, fan_out), jnp.float32, -bound, bound)
        return w, b

    w1, b1 = linear(ks[0], ks[1], input_size, fc1_unit)
    w3a, b3a = linear(ks[2], ks[3], fc1_unit, fc2_unit)
    w3v, b3v = linear(ks[4], ks[5], fc1_unit, fc2_unit)
    w4a, b4a = linear(ks[6], ks[7], fc2_unit, output_size)
    w4v, b4v = linear(ks[8], ks[9], fc2_unit, 1)
    return dict(w1=w1, b1=b1, w3a=w3a, b3a=b3a, w3v=w3v, b3v=b3v,
                w4a=w4a, b4a=b4a, w4v=w4v, b4v=b4v)


def fuse_params(p, wdtype=jnp.bfloat16):
    """Fuse streams/heads into lane-dense (128-multiple) weights; cast weights to bf16.
    All padding is zeros -> numerically exact."""
    in_size, fc1 = p["w1"].shape
    fc2 = p["w3a"].shape[1]
    out = p["w4a"].shape[1]

    F1 = _round_up(fc1, 128)          # padded hidden-1 width
    F2 = _round_up(2 * fc2, 128)      # padded fused adv|val stream width
    HW = _round_up(out + 1, 128)      # padded head width (adv cols + val col)

    w1 = jnp.zeros((in_size, F1), jnp.float32).at[:, :fc1].set(p["w1"])
    b1 = jnp.zeros((1, F1), jnp.float32).at[:, :fc1].set(p["b1"])

    w3 = jnp.zeros((F1, F2), jnp.float32)
    w3 = w3.at[:fc1, :fc2].set(p["w3a"]).at[:fc1, fc2:2 * fc2].set(p["w3v"])
    b3 = jnp.zeros((1, F2), jnp.float32)
    b3 = b3.at[:, :fc2].set(p["b3a"]).at[:, fc2:2 * fc2].set(p["b3v"])

    w4 = jnp.zeros((F2, HW), jnp.float32)
    w4 = w4.at[:fc2, :out].set(p["w4a"]).at[fc2:2 * fc2, out:out + 1].set(p["w4v"])
    b4 = jnp.zeros((1, HW), jnp.float32)
    b4 = b4.at[:, :out].set(p["b4a"]).at[:, out:out + 1].set(p["b4v"])

    return dict(
        w1=w1.astype(wdtype), b1=b1,
        w3=w3.astype(wdtype), b3=b3,
        w4=w4.astype(wdtype), b4=b4,
        out_size=out,
    )


# --------------------------------------------------------------------------------------
# References
# --------------------------------------------------------------------------------------
def reference_forward_f32(x, p):
    """Pure f32 reference of the module's forward (exact PyTorch semantics)."""
    h = jnp.maximum(x @ p["w1"] + p["b1"], 0.0)
    a = jnp.maximum(h @ p["w3a"] + p["b3a"], 0.0)
    v = jnp.maximum(h @ p["w3v"] + p["b3v"], 0.0)
    adv = a @ p["w4a"] + p["b4a"]
    val = v @ p["w4v"] + p["b4v"]
    return val + adv - jnp.mean(adv)


def reference_forward_bf16(x, p):
    """Reference mirroring the kernel's precision (bf16 dot inputs, f32 accumulation)."""
    f32, bf = jnp.float32, (lambda a: a.astype(jnp.bfloat16))
    h = jnp.maximum(jnp.dot(bf(x), bf(p["w1"]), preferred_element_type=f32) + p["b1"], 0.0)
    a = jnp.maximum(jnp.dot(bf(h), bf(p["w3a"]), preferred_element_type=f32) + p["b3a"], 0.0)
    v = jnp.maximum(jnp.dot(bf(h), bf(p["w3v"]), preferred_element_type=f32) + p["b3v"], 0.0)
    adv = jnp.dot(bf(a), bf(p["w4a"]), preferred_element_type=f32) + p["b4a"]
    val = jnp.dot(bf(v), bf(p["w4v"]), preferred_element_type=f32) + p["b4v"]
    return val + adv - jnp.mean(adv)


# --------------------------------------------------------------------------------------
# Demo / correctness check
# --------------------------------------------------------------------------------------
if __name__ == "__main__":
    key = jax.random.PRNGKey(0)
    kx, kp = jax.random.split(key)

    # small shapes consistent with the module's fully-connected forward
    batch, input_size, fc1_unit, fc2_unit, output_size = 4, 32, 64, 64, 8

    x = jax.random.normal(kx, (batch, input_size), jnp.float32)
    params = init_params(kp, input_size, output_size, fc1_unit, fc2_unit)
    fused = fuse_params(params)

    q = jax.block_until_ready(qnetwork_forward(x, fused))
    assert q.shape == (batch, output_size)

    # tight check against a reference that mirrors the kernel's bf16/f32 precision
    q_bf16_ref = reference_forward_bf16(x, params)
    assert jnp.allclose(q, q_bf16_ref, atol=1e-3, rtol=1e-3), (
        float(jnp.max(jnp.abs(q - q_bf16_ref))))

    # looser sanity check against the exact f32 module semantics
    q_f32_ref = reference_forward_f32(x, params)
    assert jnp.allclose(q, q_f32_ref, atol=1e-1, rtol=1e-1), (
        float(jnp.max(jnp.abs(q - q_f32_ref))))

    # exercise the multi-tile + row-mask path (3 batch tiles, last one partially padded)
    xb = jax.random.normal(jax.random.PRNGKey(2), (40, input_size), jnp.float32)
    qb = jax.block_until_ready(qnetwork_forward(xb, fused, max_tile_rows=16))
    qb_ref = reference_forward_bf16(xb, params)
    assert qb.shape == (40, output_size)
    assert jnp.allclose(qb, qb_ref, atol=1e-3, rtol=1e-3), (
        float(jnp.max(jnp.abs(qb - qb_ref))))

    print("KERNEL_OK")
</pallas_src>

<mosaic_0001>
module attributes {stable_mosaic.version = 11 : i64} {
  func.func @qnet_kernel(%arg0: i32, %arg1: memref<16x32xbf16, #tpu.memory_space<vmem>>, %arg2: memref<32x128xbf16, #tpu.memory_space<vmem>>, %arg3: memref<1x128xf32, #tpu.memory_space<vmem>>, %arg4: memref<128x128xbf16, #tpu.memory_space<vmem>>, %arg5: memref<1x128xf32, #tpu.memory_space<vmem>>, %arg6: memref<128x128xbf16, #tpu.memory_space<vmem>>, %arg7: memref<1x128xf32, #tpu.memory_space<vmem>>, %arg8: memref<16x128xf32, #tpu.memory_space<vmem>>, %arg9: memref<1x8x128xf32, #tpu.memory_space<vmem>>) attributes {dimension_semantics = [#tpu.dimension_semantics<parallel>], iteration_bounds = array<i64: 1>, scalar_prefetch = 0 : i64, scratch_operands = 0 : i64, tpu.core_type = #tpu.core_type<tc>, window_params = [{transform_indices = @transform_0, window_bounds = array<i64: 16, 32>}, {pipeline_mode = #tpu.pipeline_mode<synchronous>, transform_indices = @transform_1, window_bounds = array<i64: 32, 128>}, {pipeline_mode = #tpu.pipeline_mode<synchronous>, transform_indices = @transform_2, window_bounds = array<i64: 1, 128>}, {pipeline_mode = #tpu.pipeline_mode<synchronous>, transform_indices = @transform_3, window_bounds = array<i64: 128, 128>}, {pipeline_mode = #tpu.pipeline_mode<synchronous>, transform_indices = @transform_4, window_bounds = array<i64: 1, 128>}, {pipeline_mode = #tpu.pipeline_mode<synchronous>, transform_indices = @transform_5, window_bounds = array<i64: 128, 128>}, {pipeline_mode = #tpu.pipeline_mode<synchronous>, transform_indices = @transform_6, window_bounds = array<i64: 1, 128>}, {transform_indices = @transform_7, window_bounds = array<i64: 16, 128>}, {transform_indices = @transform_8, window_bounds = array<i64: 1, 8, 128>}]} {
    %c0 = arith.constant 0 : index
    %c0_0 = arith.constant 0 : index
    %0 = vector.load %arg1[%c0, %c0_0] : memref<16x32xbf16, #tpu.memory_space<vmem>>, vector<16x32xbf16>
    %c0_1 = arith.constant 0 : index
    %c0_2 = arith.constant 0 : index
    %1 = vector.load %arg2[%c0_1, %c0_2] : memref<32x128xbf16, #tpu.memory_space<vmem>>, vector<32x128xbf16>
    %cst = arith.constant dense<0.000000e+00> : vector<16x128xf32>
    %2 = tpu.matmul %0, %1, %cst {dimension_numbers = #tpu.dot_dimension_numbers<[1], [0], [0], [1], [0, 0, 1, 1], [], []>} : vector<16x32xbf16>, vector<32x128xbf16>, vector<16x128xf32> -> vector<16x128xf32>
    %c0_3 = arith.constant 0 : index
    %c0_4 = arith.constant 0 : index
    %3 = vector.load %arg3[%c0_3, %c0_4] : memref<1x128xf32, #tpu.memory_space<vmem>>, vector<1x128xf32>
    %4 = vector.broadcast %3 : vector<1x128xf32> to vector<16x128xf32>
    %5 = arith.addf %2, %4 : vector<16x128xf32>
    %cst_5 = arith.constant 0.000000e+00 : f32
    %6 = vector.broadcast %cst_5 : f32 to vector<16x128xf32>
    %7 = arith.maximumf %5, %6 : vector<16x128xf32>
    %8 = arith.truncf %7 : vector<16x128xf32> to vector<16x128xbf16>
    %c0_6 = arith.constant 0 : index
    %c0_7 = arith.constant 0 : index
    %9 = vector.load %arg4[%c0_6, %c0_7] : memref<128x128xbf16, #tpu.memory_space<vmem>>, vector<128x128xbf16>
    %cst_8 = arith.constant dense<0.000000e+00> : vector<16x128xf32>
    %10 = tpu.matmul %8, %9, %cst_8 {dimension_numbers = #tpu.dot_dimension_numbers<[1], [0], [0], [1], [0, 0, 1, 1], [], []>} : vector<16x128xbf16>, vector<128x128xbf16>, vector<16x128xf32> -> vector<16x128xf32>
    %c0_9 = arith.constant 0 : index
    %c0_10 = arith.constant 0 : index
    %11 = vector.load %arg5[%c0_9, %c0_10] : memref<1x128xf32, #tpu.memory_space<vmem>>, vector<1x128xf32>
    %12 = vector.broadcast %11 : vector<1x128xf32> to vector<16x128xf32>
    %13 = arith.addf %10, %12 : vector<16x128xf32>
    %cst_11 = arith.constant 0.000000e+00 : f32
    %14 = vector.broadcast %cst_11 : f32 to vector<16x128xf32>
    %15 = arith.maximumf %13, %14 : vector<16x128xf32>
    %16 = arith.truncf %15 : vector<16x128xf32> to vector<16x128xbf16>
    %c0_12 = arith.constant 0 : index
    %c0_13 = arith.constant 0 : index
    %17 = vector.load %arg6[%c0_12, %c0_13] : memref<128x128xbf16, #tpu.memory_space<vmem>>, vector<128x128xbf16>
    %cst_14 = arith.constant dense<0.000000e+00> : vector<16x128xf32>
    %18 = tpu.matmul %16, %17, %cst_14 {dimension_numbers = #tpu.dot_dimension_numbers<[1], [0], [0], [1], [0, 0, 1, 1], [], []>} : vector<16x128xbf16>, vector<128x128xbf16>, vector<16x128xf32> -> vector<16x128xf32>
    %c0_15 = arith.constant 0 : index
    %c0_16 = arith.constant 0 : index
    %19 = vector.load %arg7[%c0_15, %c0_16] : memref<1x128xf32, #tpu.memory_space<vmem>>, vector<1x128xf32>
    %20 = vector.broadcast %19 : vector<1x128xf32> to vector<16x128xf32>
    %21 = arith.addf %18, %20 : vector<16x128xf32>
    %22 = vector.extract_strided_slice %21 {offsets = [0, 8], sizes = [16, 1], strides = [1, 1]} : vector<16x128xf32> to vector<16x1xf32>
    %23 = vector.broadcast %22 : vector<16x1xf32> to vector<16x128xf32>
    %24 = arith.addf %21, %23 : vector<16x128xf32>
    %c0_17 = arith.constant 0 : index
    %c0_18 = arith.constant 0 : index
    %25 = vector.load %arg8[%c0_17, %c0_18] : memref<16x128xf32, #tpu.memory_space<vmem>>, vector<16x128xf32>
    tpu.vector_store %arg8[%c0_17, %c0_18], %24 {strides = array<i32>} : memref<16x128xf32, #tpu.memory_space<vmem>>, vector<16x128xf32>,
    %c16_i32 = arith.constant 16 : i32
    %26 = arith.muli %arg0, %c16_i32 : i32
    %27 = tpu.iota {dimensions = array<i32: 0>} : vector<16x1xi32>
    %28 = vector.broadcast %26 : i32 to vector<16x1xi32>
    %29 = arith.addi %28, %27 : vector<16x1xi32>
    %c4_i32 = arith.constant 4 : i32
    %30 = vector.broadcast %c4_i32 : i32 to vector<16x1xi32>
    %31 = arith.cmpi slt, %29, %30 : vector<16x1xi32>
    %cst_19 = arith.constant 0.000000e+00 : f32
    %32 = vector.shape_cast %31 : vector<16x1xi1> to vector<16x1xi1>
    %33 = vector.broadcast %32 : vector<16x1xi1> to vector<16x128xi1>
    %34 = vector.broadcast %cst_19 : f32 to vector<16x128xf32>
    %35 = arith.select %33, %21, %34 : vector<16x128xi1>, vector<16x128xf32>
    %36 = vector.shape_cast %35 : vector<16x128xf32> to vector<1x16x128xf32>
    %cst_20 = arith.constant dense<0.000000e+00> : vector<1xf32>
    %37 = vector.multi_reduction <add>, %36, %cst_20 [1, 2] : vector<1x16x128xf32> to vector<1xf32>
    %38 = vector.shape_cast %37 : vector<1xf32> to vector<1x1x1xf32>
    %39 = vector.extract %38[0, 0, 0] : f32 from vector<1x1x1xf32>
    %cst_21 = arith.constant 0.000000e+00 : f32
    %40 = vector.broadcast %cst_21 : f32 to vector<16x1xf32>
    %41 = arith.select %31, %22, %40 : vector<16x1xi1>, vector<16x1xf32>
    %42 = vector.shape_cast %41 : vector<16x1xf32> to vector<1x16x1xf32>
    %cst_22 = arith.constant dense<0.000000e+00> : vector<1xf32>
    %43 = vector.multi_reduction <add>, %42, %cst_22 [1, 2] : vector<1x16x1xf32> to vector<1xf32>
    %44 = vector.shape_cast %43 : vector<1xf32> to vector<1x1x1xf32>
    %45 = vector.extract %44[0, 0, 0] : f32 from vector<1x1x1xf32>
    %46 = arith.subf %39, %45 : f32
    %47 = vector.broadcast %46 : f32 to vector<1x8x128xf32>
    %c0_23 = arith.constant 0 : index
    %c0_24 = arith.constant 0 : index
    %c0_25 = arith.constant 0 : index
    %48 = vector.load %arg9[%c0_23, %c0_24, %c0_25] : memref<1x8x128xf32, #tpu.memory_space<vmem>>, vector<1x8x128xf32>
    tpu.vector_store %arg9[%c0_23, %c0_24, %c0_25], %47 {strides = array<i32>} : memref<1x8x128xf32, #tpu.memory_space<vmem>>, vector<1x8x128xf32>,
    return
  }
  func.func @transform_0(%arg0: i32) -> (i32, i32) {
    %c0_i32 = arith.constant 0 : i32
    %c0_i32_0 = arith.constant 0 : i32
    return %arg0, %c0_i32 : i32, i32
  }
  func.func @transform_1(%arg0: i32) -> (i32, i32) {
    %c0_i32 = arith.constant 0 : i32
    %c0_i32_0 = arith.constant 0 : i32
    %c0_i32_1 = arith.constant 0 : i32
    return %c0_i32, %c0_i32_0 : i32, i32
  }
  func.func @transform_2(%arg0: i32) -> (i32, i32) {
    %c0_i32 = arith.constant 0 : i32
    %c0_i32_0 = arith.constant 0 : i32
    %c0_i32_1 = arith.constant 0 : i32
    return %c0_i32, %c0_i32_0 : i32, i32
  }
  func.func @transform_3(%arg0: i32) -> (i32, i32) {
    %c0_i32 = arith.constant 0 : i32
    %c0_i32_0 = arith.constant 0 : i32
    %c0_i32_1 = arith.constant 0 : i32
    return %c0_i32, %c0_i32_0 : i32, i32
  }
  func.func @transform_4(%arg0: i32) -> (i32, i32) {
    %c0_i32 = arith.constant 0 : i32
    %c0_i32_0 = arith.constant 0 : i32
    %c0_i32_1 = arith.constant 0 : i32
    return %c0_i32, %c0_i32_0 : i32, i32
  }
  func.func @transform_5(%arg0: i32) -> (i32, i32) {
    %c0_i32 = arith.constant 0 : i32
    %c0_i32_0 = arith.constant 0 : i32
    %c0_i32_1 = arith.constant 0 : i32
    return %c0_i32, %c0_i32_0 : i32, i32
  }
  func.func @transform_6(%arg0: i32) -> (i32, i32) {
    %c0_i32 = arith.constant 0 : i32
    %c0_i32_0 = arith.constant 0 : i32
    %c0_i32_1 = arith.constant 0 : i32
    return %c0_i32, %c0_i32_0 : i32, i32
  }
  func.func @transform_7(%arg0: i32) -> (i32, i32) {
    %c0_i32 = arith.constant 0 : i32
    %c0_i32_0 = arith.constant 0 : i32
    return %arg0, %c0_i32 : i32, i32
  }
  func.func @transform_8(%arg0: i32) -> (i32, i32, i32) {
    %c0_i32 = arith.constant 0 : i32
    %c0_i32_0 = arith.constant 0 : i32
    %c0_i32_1 = arith.constant 0 : i32
    return %arg0, %c0_i32, %c0_i32_0 : i32, i32, i32
  }
}

</mosaic_0001>

<bundles_post_ra>
// kernel: tpu_custom_call.1
= control target key start
LH: loop header
LB: loop body
LE: loop exit
PB: predicated region body
PF: predicated region fallthrough
CT: control target
= control target key end

     0   :  { %14 = vsyncpa [#allocation3], 0  ;;  %s768_s0 = inlined_call_operand.hbm [shape: bf16[16,32], index: 0, kind: input, shape index: {}]   ;;  %s769_s1 = inlined_call_operand.hbm [shape: bf16[32,128], index: 1, kind: input, shape index: {}]   ;;  %s770_s2 = inlined_call_operand.vmem [shape: f32[1,128], index: 2, kind: input, shape index: {}]   ;;  %s771_s3 = inlined_call_operand.hbm [shape: bf16[128,128], index: 3, kind: input, shape index: {}]   ;;  %s772_s4 = inlined_call_operand.vmem [shape: f32[1,128], index: 4, kind: input, shape index: {}]   ;;  %s773_s5 = inlined_call_operand.hbm [shape: bf16[128,128], index: 5, kind: input, shape index: {}]   ;;  %s774_s6 = inlined_call_operand.vmem [shape: f32[1,128], index: 6, kind: input, shape index: {}]   ;;  %s775_s7 = inlined_call_operand.hbm [shape: f32[16,128], index: 7, kind: output, shape index: {0}]   ;;  %s776_s8 = inlined_call_operand.hbm [shape: f32[1,8,128], index: 8, kind: output, shape index: {1}]  }
   0x1   :  { %15 = vsyncpa [#allocation6], 0 }
   0x2   :  { %16 = vsyncpa [#allocation9], 0 }
   0x3   :  { %17 = vsyncpa [#allocation4], 0 }
   0x4   :  { %18 = vsyncpa [#allocation12], 0  ;;  %s36_s29 = sshll.u32 %s769_s1, 4  ;;  %s683_s30 = smov [#allocation5]   ;;  %s37_s29 = int_to_ptr.hbm [resolvable:$true] %s36_s29 }
   0x5   :  { %s38_s9 = sshll.u32 %s683_s30, 4  ;;  %s23_s12 = sshll.u32 %s768_s0, 4  ;;  %s39_s9 = int_to_ptr.vmem [resolvable:$true] %s38_s9  ;;  %s24_s12 = int_to_ptr.hbm [resolvable:$true] %s23_s12 }
   0x6   :  { %s684_s13 = smov 64   ;;  %s685_s14 = smov 4  }
   0x7   :  { %44 = dma.hbm_to_vmem [thread:$0]  %s37_s29, 256, %s39_s9, [#allocation6], %s684_s13, %s684_s13, %s685_s14  }
   0x8   :  { %s686_s15 = smov [#allocation2]   ;;  %s51_s19 = sshll.u32 %s771_s3, 4  ;;  %s52_s19 = int_to_ptr.hbm [resolvable:$true] %s51_s19 }
   0x9   :  { %s25_s16 = sshll.u32 %s686_s15, 4  ;;  %s66_s21 = sshll.u32 %s773_s5, 4  ;;  %s26_s16 = int_to_ptr.vmem [resolvable:$true] %s25_s16  ;;  %s67_s21 = int_to_ptr.hbm [resolvable:$true] %s66_s21 }
   0xa   :  { %31 = dma.hbm_to_vmem [thread:$0]  %s24_s12, 128, %s26_s16, [#allocation3], %s684_s13, %s684_s13, %s685_s14  }
   0xb   :  { %s687_s22 = smov [#allocation7]   ;;  %s688_s0 = smov [#allocation8]  }
   0xc   :  { %s53_s23 = sshll.u32 %s687_s22, 4  ;;  %s68_s24 = sshll.u32 %s688_s0, 4  ;;  %s54_s23 = int_to_ptr.vmem [resolvable:$true] %s53_s23  ;;  %s69_s24 = int_to_ptr.vmem [resolvable:$true] %s68_s24 }
   0xd   :  { %59 = dma.hbm_to_vmem [thread:$0]  %s52_s19, 1024, %s54_s23, [#allocation6], %s684_s13, %s684_s13, %s685_s14  }
   0xe   :  { %74 = dma.hbm_to_vmem [thread:$0]  %s67_s21, 1024, %s69_s24, [#allocation9], %s684_s13, %s684_s13, %s685_s14  }
   0xf   :  { %673 = dma.done.wait [#allocation3], 128  }
  0x10   :  { %674 = vsyncadd [#allocation3], 4294967168 }
  0x11   :  { %675 = dma.done.wait [#allocation6], 1280  }
  0x12   :  { %676 = vsyncadd [#allocation6], 4294966016 }
  0x13   :  { %677 = dma.done.wait [#allocation9], 1024  }
  0x14   :  { %678 = vsyncadd [#allocation9], 4294966272  ;;  %v490_v0 = vld [vmem:[#allocation5 + $0x8] sm:$0xff]  ;;  %v489_v2 = vld [vmem:[#allocation5] sm:$0xff]  ;;  %vm121_vm0 = vcmask 261120   ;;  %v689_v35 = vmov 8   ;;  %v324_v36 = vlaneseq }
  0x15   :  { %v498_v1 = vld [vmem:[#allocation7 + $0x38] sm:$0xff]  ;;  %131 = vmatpush.bf16.msra.mxu0 %v490_v0  ;;  %v497_v3 = vld [vmem:[#allocation7 + $0x30] sm:$0xff]  ;;  %v488_v4 = vld [vmem:[#allocation2] sm:$0xff]  ;;  %524 = vset.pattern.permute.xlu2 %v689_v35  ;;  %v691_v44 = vmov 0.0   ;;  %vm358_vm2 = vcmask 7168   ;;  %s380_s9 = sshll.u32 %s775_s7, 4  ;;  %s381_s9 = int_to_ptr.hbm [resolvable:$true] %s380_s9 }
  0x16   :  { %210 = vmatpush.bf16.msra.mxu1 %v498_v1  ;;  %v496_v5 = vld [vmem:[#allocation7 + $0x28] sm:$0xff]  ;;  %v495_v6 = vld [vmem:[#allocation7 + $0x20] sm:$0xff]  ;;  %v494_v7 = vld [vmem:[#allocation7 + $0x18] sm:$0xff]  ;;  %525 = vset.pattern.permute.xlu0 %v689_v35  ;;  %v325_v37 = vshrl.u32 %v324_v36, 7  ;;  %s693_s10 = smov 128   ;;  %s694_s11 = smov 8  }
  0x17   :  { %v493_v8 = vld [vmem:[#allocation7 + $0x10] sm:$0xff]  ;;  %v492_v9 = vld [vmem:[#allocation7 + $0x8] sm:$0xff]  ;;  %v491_v10 = vld [vmem:[#allocation7] sm:$0xff]  ;;  %s695_s13 = smov [#allocation11]   ;;  %s394_s7 = sshll.u32 %s776_s8, 4  ;;  %s395_s7 = int_to_ptr.hbm [resolvable:$true] %s394_s7 }
  0x18   :  { %v506_v11 = vld [vmem:[#allocation8 + $0x38] sm:$0xff]  ;;  %v505_v12 = vld [vmem:[#allocation8 + $0x30] sm:$0xff]  ;;  %v504_v13 = vld [vmem:[#allocation8 + $0x28] sm:$0xff]  ;;  %vm330_vm1 = vcmp.lt.s32.totalorder %v325_v37, 4  ;;  %s392_s14 = sshll.u32 %s695_s13, 4  ;;  %s393_s14 = int_to_ptr.vmem [resolvable:$true] %s392_s14 }
  0x19   :  { %132 = vmatpush.bf16.msra.mxu0 %v489_v2  ;;  %295 = vmatpush.bf16.msra.mxu2 %v506_v11  ;;  %v503_v14 = vld [vmem:[#allocation8 + $0x20] sm:$0xff]  ;;  %v526_v16 = vld [vmem:[%s770_s2] ss:$0 sm:$0xff]  ;;  %v502_v23 = vld [vmem:[#allocation8 + $0x18] sm:$0xff] }
  0x1a   :  { %211 = vmatpush.bf16.msra.mxu1 %v497_v3  ;;  %v501_v24 = vld [vmem:[#allocation8 + $0x10] sm:$0xff]  ;;  %v500_v25 = vld [vmem:[#allocation8 + $0x8] sm:$0xff]  ;;  %v499_v26 = vld [vmem:[#allocation8] sm:$0xff] }
  0x1b   :  { %v527_v28 = vld [vmem:[%s772_s4] ss:$0 sm:$0xff]  ;;  %s690_s4 = smov 120  }
  0x1c   :  { %423 = vmatmul.msk.bf16.vlgmr.msra.gmra.mxu0 %vm121_vm0, %v488_v4  ;;  %v528_v38 = vld [vmem:[%s774_s6] ss:$0 sm:$0xff]  ;;  %s692_s6 = smov [#allocation10]  }
  0x1d   :  { %296 = vmatpush.bf16.msra.mxu2 %v505_v12  ;;  %s378_s28 = sshll.u32 %s692_s6, 4  ;;  %s379_s28 = int_to_ptr.vmem [resolvable:$true] %s378_s28 }
  0x1e   :  { %212 = vmatpush.bf16.msra.mxu1 %v496_v5 }
  0x21   :  { %297 = vmatpush.bf16.msra.mxu2 %v504_v13 }
  0x22   :  { %213 = vmatpush.bf16.msra.mxu1 %v495_v6 }
  0x25   :  { %298 = vmatpush.bf16.msra.mxu2 %v503_v14 }
  0x26   :  { %214 = vmatpush.bf16.msra.mxu1 %v494_v7 }
  0x29   :  { %299 = vmatpush.bf16.msra.mxu2 %v502_v23 }
  0x2a   :  { %215 = vmatpush.bf16.msra.mxu1 %v493_v8 }
  0x2d   :  { %300 = vmatpush.bf16.msra.mxu2 %v501_v24 }
  0x2e   :  { %216 = vmatpush.bf16.msra.mxu1 %v492_v9 }
  0x31   :  { %301 = vmatpush.bf16.msra.mxu2 %v500_v25 }
  0x32   :  { %217 = vmatpush.bf16.msra.mxu1 %v491_v10 }
  0x35   :  { %302 = vmatpush.bf16.msra.mxu2 %v499_v26 }
  0x99   :  { %v134_v15 = vpop.f32.mrf.mxu0 }
  0x9a   :  { %v135_v17 = vadd.f32 %v526_v16, %v134_v15 }
  0x9c   :  { %v139_v20 = vmax.f32 %v135_v17, 0.0 }
  0xa1   :  { %v136_v18 = vpop.f32.mrf.mxu0 }
  0xa2   :  { %v137_v19 = vadd.f32 %v526_v16, %v136_v18 }
  0xa4   :  { %v140_v21 = vmax.f32 %v137_v19, 0.0 }
  0xa6   :  { %v141_v22 = vpack.c.bf16 %v140_v21, %v139_v20 }
  0xa8   :  { %218 = vmatmul.bf16.vlgmr.msra.gmra.mxu1 %v141_v22 }
 0x125   :  { %v219_v27 = vpop.f32.mrf.mxu1 }
 0x126   :  { %v220_v29 = vadd.f32 %v527_v28, %v219_v27 }
 0x128   :  { %v224_v32 = vmax.f32 %v220_v29, 0.0 }
 0x12d   :  { %v221_v30 = vpop.f32.mrf.mxu1 }
 0x12e   :  { %v222_v31 = vadd.f32 %v527_v28, %v221_v30 }
 0x130   :  { %v225_v33 = vmax.f32 %v222_v31, 0.0 }
 0x132   :  { %v226_v34 = vpack.c.bf16 %v225_v33, %v224_v32 }
 0x134   :  { %303 = vmatmul.bf16.vlgmr.msra.gmra.mxu2 %v226_v34 }
 0x1b7   :  { %v304_v39 = vpop.f32.mrf.mxu2 }
 0x1b8   :  { %v305_v40 = vadd.f32 %v528_v38, %v304_v39 }
 0x1ba   :  { %311 = vperm.xlu2 %524, %v305_v40   ;;  %v336_v41 = vsel %vm330_vm1, %v305_v40, 0.0 }
 0x1bb   :  { %339 = vadd.xlane.f32.xlu1 %v336_v41  ;;  %352 = vrot.lane.b32.xlu0 %v336_v41, %s690_s4 }
 0x1bf   :  { %v306_v42 = vpop.f32.mrf.mxu2 }
 0x1c0   :  { %v307_v43 = vadd.f32 %v528_v38, %v306_v42 }
 0x1c2   :  { %316 = vperm.xlu2 %524, %v307_v43  }
 0x1c3   :  { %354 = vrot.lane.b32.xlu0 %v691_v44, %s690_s4 }
 0x214   :  { %v312_v45 = vpop.permute.xlu2 %311 }
 0x215   :  { %v319_v46 = vadd.f32 %v312_v45, %v305_v40 }
 0x217   :  { %321 = vst [vmem:[#allocation10] sm:$0xff] %v319_v46 }
 0x21c   :  { %v317_v47 = vpop.permute.xlu2 %316 }
 0x21d   :  { %v320_v48 = vadd.f32 %v317_v47, %v307_v43 }
 0x21f   :  { %322 = vst [vmem:[#allocation10 + $0x8] sm:$0xff] %v320_v48 }
 0x220   :  { %386 = dma.vmem_to_hbm [thread:$0]  %s379_s28, 256, %s381_s9, [#allocation4], %s693_s10, %s693_s10, %s694_s11  }
 0x22d   :  { %v353_v49 = vpop.permute.xlu0 %352 }
 0x22e   :  { %v340_v50 = vpop.xlane.xlu1 %339  ;;  %v359_v56 = vsel %vm358_vm2, %v353_v49, 0.0 }
 0x22f   :  { %v341_v51 = vrot.slane %v340_v50, 4 }
 0x231   :  { %v342_v52 = vadd.f32 %v341_v51, %v340_v50 }
 0x233   :  { %v343_v53 = vrot.slane %v342_v52, 2 }
 0x235   :  { %v355_v54 = vpop.permute.xlu0 %354  ;;  %v344_v55 = vadd.f32 %v343_v53, %v342_v52 }
 0x236   :  { %v360_v57 = vsel %vm358_vm2, %v355_v54, 0.0 }
 0x237   :  { %v361_v58 = vadd.f32 %v360_v57, %v359_v56  ;;  %v345_v59 = vrot.slane %v344_v55, 1 }
 0x239   :  { %362 = vadd.xlane.f32.xlu1 %v361_v58  ;;  %v346_v60 = vadd.f32 %v345_v59, %v344_v55 }
 0x23b   :  { %507 = vpush %v346_v60 }
 0x26c   :  { %s508_s12 = spop %507 }
 0x2ac   :  { %v363_v61 = vpop.xlane.xlu1 %362 }
 0x2ad   :  { %v364_v62 = vrot.slane %v363_v61, 4 }
 0x2af   :  { %v365_v63 = vadd.f32 %v364_v62, %v363_v61 }
 0x2b1   :  { %v366_v0 = vrot.slane %v365_v63, 2 }
 0x2b3   :  { %v367_v1 = vadd.f32 %v366_v0, %v365_v63 }
 0x2b5   :  { %v368_v2 = vrot.slane %v367_v1, 1 }
 0x2b7   :  { %v369_v3 = vadd.f32 %v368_v2, %v367_v1 }
 0x2b9   :  { %509 = vpush %v369_v3 }
 0x2ea   :  { %s510_s17 = spop %509 }
 0x2eb   :  { %s371_s18 = ssub.f32 %s508_s12, %s510_s17 }
 0x2ed   :  { %v372_v4 = vstv %s371_s18 }
 0x2ee   :  { %373 = vst [vmem:[#allocation11] sm:$0xff] %v372_v4 }
 0x2ef   :  { %397 = dma.vmem_to_hbm [thread:$0]  %s393_s14, 128, %s395_s7, [#allocation12]  }
 0x2f0   :  { %679 = dma.done.wait [#allocation4], 256  }
 0x2f1   :  { %680 = vsyncadd [#allocation4], 4294967040 }
 0x2f2   :  { %681 = dma.done.wait [#allocation12], 128  }
 0x2f3   :  { %682 = vsyncadd [#allocation12], 4294967168 }
 0x2f4   :  { %406 = vsyncpa [#allocation3], 1 }
 0x2f5   :  { %407 = vsyncpa [#allocation6], 1 }
 0x2f6   :  { %408 = vsyncpa [#allocation9], 1 }
 0x2f7   :  { %409 = vsyncpa [#allocation4], 1 }
 0x2f8   :  { %410 = vsyncpa [#allocation12], 1 }

</bundles_post_ra>
